<compile_context>
chip_gen: v5e
topology: v5e:2x2
jax: 0.10.0
libtpu: 0.0.40
codegen_flags: <defaults>
</compile_context>

<pallas_src>
import functools
import math

import jax
import jax.numpy as jnp
from jax.experimental import pallas as pl
from jax.experimental.pallas import tpu as pltpu

LN_EPS = 1e-12          # DistilBERT layer_norm_eps


def _vmem_limit_bytes():
    # ~75% of physical VMEM, capped at 64 MiB (v5e/v6e: 128 MiB -> 64 MiB,
    # v7x: 64 MiB -> 48 MiB) so compiler scratch / double-buffering has room.
    try:
        cap = int(pltpu.get_tpu_info().vmem_capacity_bytes)
    except Exception:
        cap = 128 * 1024 * 1024
    return int(min(64 * 1024 * 1024, cap * 3 // 4))


VMEM_LIMIT = _vmem_limit_bytes()


# ----------------------------- tiling helpers -----------------------------

def _tile_m(dim, target, min_tiles=1):
    """Largest multiple-of-8 divisor of `dim` <= target that (when possible)
    leaves at least `min_tiles` grid steps along M (v7x megacore); falls back
    to the full dim (always a legal block extent)."""
    cap = min(target, dim // min_tiles) if min_tiles > 1 else target
    if dim <= cap:
        return dim
    t = (cap // 8) * 8
    while t >= 8:
        if dim % t == 0:
            return t
        t -= 8
    return dim


def _tile_nk(dim, target):
    """Largest divisor of `dim` <= target that is a multiple of 256 (v6e/v7x
    2x256 MXU), falling back to multiples of 128, then the full dim."""
    if dim <= target:
        return dim
    for base in (256, 128):
        t = (target // base) * base
        while t >= base:
            if dim % t == 0:
                return t
            t -= base
    return dim


# ----------------------------- math helpers -----------------------------

def _erf(x):
    # Abramowitz & Stegun 7.1.26 rational approximation (|err| <= 1.5e-7).
    # The divide runs on the EUP via pl.reciprocal(approx=True); exp is EUP.
    a1, a2, a3, a4, a5 = (0.254829592, -0.284496736, 1.421413741,
                          -1.453152027, 1.061405429)
    p = 0.3275911
    s = jnp.sign(x)
    ax = jnp.abs(x)
    t = pl.reciprocal(1.0 + p * ax, approx=True)
    poly = ((((a5 * t + a4) * t + a3) * t + a2) * t + a1) * t
    return s * (1.0 - poly * jnp.exp(-ax * ax))


def _gelu_exact(x):
    return 0.5 * x * (1.0 + _erf(x * (1.0 / math.sqrt(2.0))))


def _ln(h, g_ref, b_ref, eps):
    mean = jnp.mean(h, axis=-1, keepdims=True)
    c = h - mean
    var = jnp.mean(c * c, axis=-1, keepdims=True)
    y = c * jax.lax.rsqrt(var + eps)
    return y * g_ref[...].astype(jnp.float32) + b_ref[...].astype(jnp.float32)


# ----------------------------- kernels -----------------------------

def _linear_kernel(x_ref, w_ref, b_ref, o_ref, acc_ref, *, act):
    # K-tiled matmul with f32 VMEM accumulator (used only when K > tk).
    k = pl.program_id(2)

    @pl.when(k == 0)
    def _():
        acc_ref[...] = jnp.zeros_like(acc_ref)

    acc_ref[...] += jnp.dot(x_ref[...], w_ref[...],
                            preferred_element_type=jnp.float32)

    @pl.when(k == pl.num_programs(2) - 1)
    def _():
        h = acc_ref[...] + b_ref[...].astype(jnp.float32)
        if act == "gelu":
            h = _gelu_exact(h)
        o_ref[...] = h.astype(o_ref.dtype)


def _linear_noacc_kernel(x_ref, w_ref, b_ref, o_ref, *, act):
    # Full-K block: no accumulator round-trip, no init/finalize phases.
    h = jnp.dot(x_ref[...], w_ref[...], preferred_element_type=jnp.float32)
    h = h + b_ref[...].astype(jnp.float32)
    if act == "gelu":
        h = _gelu_exact(h)
    o_ref[...] = h.astype(o_ref.dtype)


def _linear_res_ln_kernel(x_ref, w_ref, b_ref, r_ref, g_ref, bb_ref,
                          o_ref, acc_ref, *, eps):
    # matmul + bias + residual-add + LayerNorm fused epilogue (K-tiled).
    # N (= hidden) is NOT tiled so the LayerNorm reduction sees the full row.
    k = pl.program_id(1)

    @pl.when(k == 0)
    def _():
        acc_ref[...] = jnp.zeros_like(acc_ref)

    acc_ref[...] += jnp.dot(x_ref[...], w_ref[...],
                            preferred_element_type=jnp.float32)

    @pl.when(k == pl.num_programs(1) - 1)
    def _():
        h = (acc_ref[...] + b_ref[...].astype(jnp.float32)
             + r_ref[...].astype(jnp.float32))
        o_ref[...] = _ln(h, g_ref, bb_ref, eps).astype(o_ref.dtype)


def _linear_res_ln_noacc_kernel(x_ref, w_ref, b_ref, r_ref, g_ref, bb_ref,
                                o_ref, *, eps):
    h = jnp.dot(x_ref[...], w_ref[...], preferred_element_type=jnp.float32)
    h = h + b_ref[...].astype(jnp.float32) + r_ref[...].astype(jnp.float32)
    o_ref[...] = _ln(h, g_ref, bb_ref, eps).astype(o_ref.dtype)


def _layernorm_kernel(x_ref, g_ref, b_ref, o_ref, *, eps):
    x = x_ref[...].astype(jnp.float32)
    o_ref[...] = _ln(x, g_ref, b_ref, eps).astype(o_ref.dtype)


def _attention_kernel(q_ref, k_ref, v_ref, m_ref, o_ref, *, dh, hp):
    # q/k/v refs: (1, S, W=hp*dh) lane-dense head-group slices of packed QKV.
    # 1/sqrt(dh) is already folded into the Q projection weights.
    S = q_ref.shape[1]
    keep = m_ref[0].astype(jnp.float32)                        # (1, S)
    # additive mask bias, hoisted out of the head loop and pre-broadcast once;
    # large finite constant (not -inf) so no NaN/inf propagation.
    bias = jnp.broadcast_to(jnp.where(keep > 0.0, 0.0, -1e30), (S, S))
    qf = q_ref[0]
    kf = k_ref[0]
    vf = v_ref[0]
    ctxs = []
    for j in range(hp):                                        # static, unrolled
        lo = j * dh
        q = qf[:, lo:lo + dh]                                  # (S, dh) bf16
        k = kf[:, lo:lo + dh]                                  # (S, dh) bf16
        v = vf[:, lo:lo + dh]                                  # (S, dh) bf16
        s = jax.lax.dot_general(q, k, (((1,), (1,)), ((), ())),
                                preferred_element_type=jnp.float32)   # (S, S)
        s = s + bias
        # max-subtraction keeps fully-masked rows finite (denominator >= 1)
        s = s - jnp.max(s, axis=-1, keepdims=True)
        e = jnp.exp(s)
        w = e * pl.reciprocal(jnp.sum(e, axis=-1, keepdims=True), approx=True)
        # attention dropout (p=0.1) is identity at inference
        ctxs.append(jnp.dot(w.astype(v.dtype), v,
                            preferred_element_type=jnp.float32))
    # single full-width (S, W) lane-dense store (no masked 64-lane partials)
    o_ref[0] = jnp.concatenate(ctxs, axis=-1).astype(o_ref.dtype)
    # TODO(synk): per-head 64-lane operand slices remain; a head-major layout
    # would remove them but costs two wrapper-side HBM transposes per layer.
    # TODO(synk): switch to a flash-style online-softmax KV-tile loop for
    # S >= 512 (v7x, 64 MiB VMEM) / S >= 1024 (v5e/v6e).


# ----------------------------- pallas_call wrappers -----------------------------

def linear(x, w, b, act=None, out_dtype=jnp.bfloat16,
           tm_target=1024, tn_target=1024, tk_target=1536):
    M, K = x.shape
    N = w.shape[1]
    tm = _tile_m(M, tm_target)
    tn = _tile_nk(N, tn_target)
    tk = _tile_nk(K, tk_target)
    b2 = b.reshape(1, N)

    if tk == K:     # full-K block: accumulator-free kernel, 2-D grid
        return pl.pallas_call(
            functools.partial(_linear_noacc_kernel, act=act),
            out_shape=jax.ShapeDtypeStruct((M, N), out_dtype),
            grid=(M // tm, N // tn),
            in_specs=[pl.BlockSpec((tm, K), lambda i, j: (i, 0)),
                      pl.BlockSpec((K, tn), lambda i, j: (0, j)),
                      pl.BlockSpec((1, tn), lambda i, j: (0, j))],
            out_specs=pl.BlockSpec((tm, tn), lambda i, j: (i, j)),
            compiler_params=pltpu.CompilerParams(
                dimension_semantics=("parallel", "parallel"),
                vmem_limit_bytes=VMEM_LIMIT),
        )(x, w, b2)

    return pl.pallas_call(
        functools.partial(_linear_kernel, act=act),
        out_shape=jax.ShapeDtypeStruct((M, N), out_dtype),
        grid=(M // tm, N // tn, K // tk),
        in_specs=[pl.BlockSpec((tm, tk), lambda i, j, k: (i, k)),
                  pl.BlockSpec((tk, tn), lambda i, j, k: (k, j)),
                  pl.BlockSpec((1, tn), lambda i, j, k: (0, j))],
        out_specs=pl.BlockSpec((tm, tn), lambda i, j, k: (i, j)),
        scratch_shapes=[pltpu.VMEM((tm, tn), jnp.float32)],
        compiler_params=pltpu.CompilerParams(
            dimension_semantics=("parallel", "parallel", "arbitrary"),
            vmem_limit_bytes=VMEM_LIMIT),
    )(x, w, b2)


def linear_res_ln(x, w, b, residual, gamma, beta, *, eps=LN_EPS,
                  tm_target=512, tk_target=1536):
    M, K = x.shape
    N = w.shape[1]
    # Keep >= 2 M-tiles when possible: M is the only "parallel" grid axis here,
    # so this keeps both v7x TensorCores busy.
    tm = _tile_m(M, tm_target, min_tiles=2)
    tk = _tile_nk(K, tk_target)
    args = (x, w, b.reshape(1, N), residual,
            gamma.reshape(1, N), beta.reshape(1, N))

    if tk == K:     # full-K block: accumulator-free kernel, 1-D grid
        return pl.pallas_call(
            functools.partial(_linear_res_ln_noacc_kernel, eps=eps),
            out_shape=jax.ShapeDtypeStruct((M, N), jnp.bfloat16),
            grid=(M // tm,),
            in_specs=[pl.BlockSpec((tm, K), lambda i: (i, 0)),
                      pl.BlockSpec((K, N), lambda i: (0, 0)),
                      pl.BlockSpec((1, N), lambda i: (0, 0)),
                      pl.BlockSpec((tm, N), lambda i: (i, 0)),
                      pl.BlockSpec((1, N), lambda i: (0, 0)),
                      pl.BlockSpec((1, N), lambda i: (0, 0))],
            out_specs=pl.BlockSpec((tm, N), lambda i: (i, 0)),
            compiler_params=pltpu.CompilerParams(
                dimension_semantics=("parallel",),
                vmem_limit_bytes=VMEM_LIMIT),
        )(*args)

    return pl.pallas_call(
        functools.partial(_linear_res_ln_kernel, eps=eps),
        out_shape=jax.ShapeDtypeStruct((M, N), jnp.bfloat16),
        grid=(M // tm, K // tk),
        in_specs=[pl.BlockSpec((tm, tk), lambda i, k: (i, k)),
                  pl.BlockSpec((tk, N), lambda i, k: (k, 0)),
                  pl.BlockSpec((1, N), lambda i, k: (0, 0)),
                  pl.BlockSpec((tm, N), lambda i, k: (i, 0)),
                  pl.BlockSpec((1, N), lambda i, k: (0, 0)),
                  pl.BlockSpec((1, N), lambda i, k: (0, 0))],
        out_specs=pl.BlockSpec((tm, N), lambda i, k: (i, 0)),
        scratch_shapes=[pltpu.VMEM((tm, N), jnp.float32)],
        compiler_params=pltpu.CompilerParams(
            dimension_semantics=("parallel", "arbitrary"),
            vmem_limit_bytes=VMEM_LIMIT),
    )(*args)


def layernorm(x, gamma, beta, *, eps=LN_EPS, tm_target=1024):
    M, H = x.shape
    tm = _tile_m(M, tm_target)
    return pl.pallas_call(
        functools.partial(_layernorm_kernel, eps=eps),
        out_shape=jax.ShapeDtypeStruct((M, H), jnp.bfloat16),
        grid=(M // tm,),
        in_specs=[pl.BlockSpec((tm, H), lambda i: (i, 0)),
                  pl.BlockSpec((1, H), lambda i: (0, 0)),
                  pl.BlockSpec((1, H), lambda i: (0, 0))],
        out_specs=pl.BlockSpec((tm, H), lambda i: (i, 0)),
        compiler_params=pltpu.CompilerParams(
            dimension_semantics=("parallel",),
            vmem_limit_bytes=VMEM_LIMIT),
    )(x, gamma.reshape(1, H), beta.reshape(1, H))


def mha(qkv, mask_f, n_heads):
    # qkv: (B, S, 3H) bf16, packed [q | k | v]; mask_f: (B, 1, S) float32.
    B, S, H3 = qkv.shape
    H = H3 // 3
    dh = H // n_heads
    # heads per grid step: make blocks 128-lane dense when possible
    hp = min(n_heads, max(1, 128 // dh))
    while n_heads % hp:
        hp -= 1
    W = hp * dh                      # lane width of each q/k/v/out block
    G = n_heads // hp                # head-groups per batch element
    nblk = H // W                    # W-wide blocks per H span inside 3H

    return pl.pallas_call(
        functools.partial(_attention_kernel, dh=dh, hp=hp),
        out_shape=jax.ShapeDtypeStruct((B, S, H), jnp.bfloat16),
        grid=(B, G),
        in_specs=[pl.BlockSpec((1, S, W), lambda b, g: (b, 0, g)),
                  pl.BlockSpec((1, S, W), lambda b, g: (b, 0, nblk + g)),
                  pl.BlockSpec((1, S, W), lambda b, g: (b, 0, 2 * nblk + g)),
                  pl.BlockSpec((1, 1, S), lambda b, g: (b, 0, 0))],
        out_specs=pl.BlockSpec((1, S, W), lambda b, g: (b, 0, g)),
        compiler_params=pltpu.CompilerParams(
            dimension_semantics=("parallel", "parallel"),
            vmem_limit_bytes=VMEM_LIMIT),
    )(qkv, qkv, qkv, mask_f)


# ----------------------------- model (glue in plain JAX) -----------------------------

def init_params(key, cfg):
    H, F, V, P = cfg["hidden"], cfg["ffn"], cfg["vocab"], cfg["max_pos"]
    L, NL, nH = cfg["layers"], cfg["num_labels"], cfg["n_heads"]
    Dh = H // nH
    scale = 1.0 / math.sqrt(Dh)
    keys = iter(jax.random.split(key, 4 + 6 * L))

    def dense(k, fan_in, fan_out):
        return jax.random.normal(k, (fan_in, fan_out), jnp.float32) * 0.02

    params = {
        "word_emb": jax.random.normal(next(keys), (V, H), jnp.float32) * 0.02,
        "pos_emb": jax.random.normal(next(keys), (P, H), jnp.float32) * 0.02,
        "emb_ln_g": jnp.ones((H,), jnp.float32),
        "emb_ln_b": jnp.zeros((H,), jnp.float32),
        "cls_w": dense(next(keys), H, NL).astype(jnp.bfloat16),
        "cls_b": jnp.zeros((NL,), jnp.float32),
        "layers": [],
    }
    for _ in range(L):
        q_w = dense(next(keys), H, H)
        k_w = dense(next(keys), H, H)
        v_w = dense(next(keys), H, H)
        q_b = jnp.zeros((H,), jnp.float32)
        # Fuse Q/K/V into one (H, 3H) weight; fold 1/sqrt(Dh) into Q (identical
        # math to scaling the attention scores).
        qkv_w = jnp.concatenate([q_w * scale, k_w, v_w], axis=1)
        qkv_b = jnp.concatenate(
            [q_b * scale, jnp.zeros((H,), jnp.float32), jnp.zeros((H,), jnp.float32)])
        params["layers"].append({
            "qkv_w": qkv_w.astype(jnp.bfloat16), "qkv_b": qkv_b,
            "o_w": dense(next(keys), H, H).astype(jnp.bfloat16),
            "o_b": jnp.zeros((H,), jnp.float32),
            "sa_ln_g": jnp.ones((H,), jnp.float32),
            "sa_ln_b": jnp.zeros((H,), jnp.float32),
            "ffn1_w": dense(next(keys), H, F).astype(jnp.bfloat16),
            "ffn1_b": jnp.zeros((F,), jnp.float32),
            "ffn2_w": dense(next(keys), F, H).astype(jnp.bfloat16),
            "ffn2_b": jnp.zeros((H,), jnp.float32),
            "out_ln_g": jnp.ones((H,), jnp.float32),
            "out_ln_b": jnp.zeros((H,), jnp.float32),
        })
    return params


def bert_for_multilabel_forward(params, input_ids, attention_mask, cfg):
    B, S = input_ids.shape
    H, nH = cfg["hidden"], cfg["n_heads"]
    M = B * S

    # Embeddings (table gathers stay in plain JAX glue), then fused LayerNorm.
    emb = (jnp.take(params["word_emb"], input_ids, axis=0)
           + params["pos_emb"][:S][None, :, :])
    x = layernorm(emb.reshape(M, H), params["emb_ln_g"], params["emb_ln_b"])
    # embedding dropout (p=0.1) is identity at inference

    mask_f = attention_mask.astype(jnp.float32).reshape(B, 1, S)

    for lp in params["layers"]:
        qkv = linear(x, lp["qkv_w"], lp["qkv_b"])                   # (M, 3H) bf16
        ctx = mha(qkv.reshape(B, S, 3 * H), mask_f, nH)             # (B, S, H) bf16
        x = linear_res_ln(ctx.reshape(M, H), lp["o_w"], lp["o_b"],  # + residual + LN
                          x, lp["sa_ln_g"], lp["sa_ln_b"])
        ff = linear(x, lp["ffn1_w"], lp["ffn1_b"], act="gelu")      # (M, F) bf16
        x = linear_res_ln(ff, lp["ffn2_w"], lp["ffn2_b"],           # + residual + LN
                          x, lp["out_ln_g"], lp["out_ln_b"])

    cls = x.reshape(B, S, H)[:, 0, :]          # last_hidden_state[:, 0, :]
    # classifier dropout (p=0.3) is identity at inference.
    # 4-wide classifier head: plain jnp (a pallas_call is pure overhead here).
    logits = (jnp.dot(cls.astype(jnp.float32),
                      params["cls_w"].astype(jnp.float32))
              + params["cls_b"])
    return logits


if __name__ == "__main__":
    cfg = dict(vocab=100, max_pos=16, hidden=128, n_heads=2,
               layers=2, ffn=256, num_labels=4)
    B, S = 2, 8

    root = jax.random.PRNGKey(0)
    pkey, ikey = jax.random.split(root)
    params = init_params(pkey, cfg)

    input_ids = jax.random.randint(ikey, (B, S), 0, cfg["vocab"], dtype=jnp.int32)
    attention_mask = jnp.array([[1, 1, 1, 1, 1, 1, 1, 1],
                                [1, 1, 1, 1, 1, 1, 0, 0]], dtype=jnp.int32)

    logits = bert_for_multilabel_forward(params, input_ids, attention_mask, cfg)
    jax.block_until_ready(logits)
    assert logits.shape == (B, cfg["num_labels"])
    assert bool(jnp.all(jnp.isfinite(logits)))
    print("KERNEL_OK")
</pallas_src>

<mosaic_0001>
module attributes {stable_mosaic.version = 11 : i64} {
  func.func @_layernorm_kernel(%arg0: i32, %arg1: memref<16x128xf32, #tpu.memory_space<vmem>>, %arg2: memref<1x128xf32, #tpu.memory_space<vmem>>, %arg3: memref<1x128xf32, #tpu.memory_space<vmem>>, %arg4: memref<16x128xbf16, #tpu.memory_space<vmem>>) attributes {dimension_semantics = [#tpu.dimension_semantics<parallel>], iteration_bounds = array<i64: 1>, scalar_prefetch = 0 : i64, scratch_operands = 0 : i64, tpu.core_type = #tpu.core_type<tc>, window_params = [{transform_indices = @transform_0, window_bounds = array<i64: 16, 128>}, {pipeline_mode = #tpu.pipeline_mode<synchronous>, transform_indices = @transform_1, window_bounds = array<i64: 1, 128>}, {pipeline_mode = #tpu.pipeline_mode<synchronous>, transform_indices = @transform_2, window_bounds = array<i64: 1, 128>}, {transform_indices = @transform_3, window_bounds = array<i64: 16, 128>}]} {
    %c0 = arith.constant 0 : index
    %c0_0 = arith.constant 0 : index
    %0 = vector.load %arg1[%c0, %c0_0] : memref<16x128xf32, #tpu.memory_space<vmem>>, vector<16x128xf32>
    %cst = arith.constant dense<0.000000e+00> : vector<16xf32>
    %1 = vector.multi_reduction <add>, %0, %cst [1] : vector<16x128xf32> to vector<16xf32>
    %2 = vector.shape_cast %1 : vector<16xf32> to vector<16x1xf32>
    %cst_1 = arith.constant 1.280000e+02 : f32
    %3 = vector.broadcast %cst_1 : f32 to vector<16x1xf32>
    %4 = arith.divf %2, %3 : vector<16x1xf32>
    %5 = vector.broadcast %4 : vector<16x1xf32> to vector<16x128xf32>
    %6 = arith.subf %0, %5 : vector<16x128xf32>
    %7 = arith.mulf %6, %6 : vector<16x128xf32>
    %cst_2 = arith.constant dense<0.000000e+00> : vector<16xf32>
    %8 = vector.multi_reduction <add>, %7, %cst_2 [1] : vector<16x128xf32> to vector<16xf32>
    %9 = vector.shape_cast %8 : vector<16xf32> to vector<16x1xf32>
    %cst_3 = arith.constant 1.280000e+02 : f32
    %10 = vector.broadcast %cst_3 : f32 to vector<16x1xf32>
    %11 = arith.divf %9, %10 : vector<16x1xf32>
    %cst_4 = arith.constant 9.99999996E-13 : f32
    %12 = vector.broadcast %cst_4 : f32 to vector<16x1xf32>
    %13 = arith.addf %11, %12 : vector<16x1xf32>
    %14 = math.rsqrt %13 : vector<16x1xf32>
    %15 = vector.broadcast %14 : vector<16x1xf32> to vector<16x128xf32>
    %16 = arith.mulf %6, %15 : vector<16x128xf32>
    %c0_5 = arith.constant 0 : index
    %c0_6 = arith.constant 0 : index
    %17 = vector.load %arg2[%c0_5, %c0_6] : memref<1x128xf32, #tpu.memory_space<vmem>>, vector<1x128xf32>
    %18 = vector.broadcast %17 : vector<1x128xf32> to vector<16x128xf32>
    %19 = arith.mulf %16, %18 : vector<16x128xf32>
    %c0_7 = arith.constant 0 : index
    %c0_8 = arith.constant 0 : index
    %20 = vector.load %arg3[%c0_7, %c0_8] : memref<1x128xf32, #tpu.memory_space<vmem>>, vector<1x128xf32>
    %21 = vector.broadcast %20 : vector<1x128xf32> to vector<16x128xf32>
    %22 = arith.addf %19, %21 : vector<16x128xf32>
    %23 = arith.truncf %22 : vector<16x128xf32> to vector<16x128xbf16>
    %c0_9 = arith.constant 0 : index
    %c0_10 = arith.constant 0 : index
    %24 = vector.load %arg4[%c0_9, %c0_10] : memref<16x128xbf16, #tpu.memory_space<vmem>>, vector<16x128xbf16>
    tpu.vector_store %arg4[%c0_9, %c0_10], %23 {strides = array<i32>} : memref<16x128xbf16, #tpu.memory_space<vmem>>, vector<16x128xbf16>,
    return
  }
  func.func @transform_0(%arg0: i32) -> (i32, i32) {
    %c0_i32 = arith.constant 0 : i32
    %c0_i32_0 = arith.constant 0 : i32
    return %arg0, %c0_i32 : i32, i32
  }
  func.func @transform_1(%arg0: i32) -> (i32, i32) {
    %c0_i32 = arith.constant 0 : i32
    %c0_i32_0 = arith.constant 0 : i32
    %c0_i32_1 = arith.constant 0 : i32
    return %c0_i32, %c0_i32_0 : i32, i32
  }
  func.func @transform_2(%arg0: i32) -> (i32, i32) {
    %c0_i32 = arith.constant 0 : i32
    %c0_i32_0 = arith.constant 0 : i32
    %c0_i32_1 = arith.constant 0 : i32
    return %c0_i32, %c0_i32_0 : i32, i32
  }
  func.func @transform_3(%arg0: i32) -> (i32, i32) {
    %c0_i32 = arith.constant 0 : i32
    %c0_i32_0 = arith.constant 0 : i32
    return %arg0, %c0_i32 : i32, i32
  }
}

</mosaic_0001>

<bundles_post_ra>
// kernel: tpu_custom_call.1
= control target key start
LH: loop header
LB: loop body
LE: loop exit
PB: predicated region body
PF: predicated region fallthrough
CT: control target
= control target key end

     0   :  { %8 = vsyncpa [#allocation3], 0  ;;  %s269_s0 = inlined_call_operand.hbm [shape: f32[16,128], index: 0, kind: input, shape index: {}]   ;;  %s270_s1 = inlined_call_operand.hbm [shape: f32[1,128], index: 1, kind: input, shape index: {}]   ;;  %s271_s2 = inlined_call_operand.vmem [shape: f32[1,128], index: 2, kind: input, shape index: {}]   ;;  %s272_s3 = inlined_call_operand.hbm [shape: bf16[16,128], index: 3, kind: output, shape index: {}]  }
   0x1   :  { %9 = vsyncpa [#allocation6], 0 }
   0x2   :  { %10 = vsyncpa [#allocation4], 0  ;;  %s15_s14 = sshll.u32 %s269_s0, 4  ;;  %s229_s15 = smov [#allocation2]   ;;  %s16_s14 = int_to_ptr.hbm [resolvable:$true] %s15_s14 }
   0x3   :  { %s17_s16 = sshll.u32 %s229_s15, 4  ;;  %s29_s19 = sshll.u32 %s270_s1, 4  ;;  %s18_s16 = int_to_ptr.vmem [resolvable:$true] %s17_s16  ;;  %s30_s19 = int_to_ptr.hbm [resolvable:$true] %s29_s19 }
   0x4   :  { %s230_s20 = smov 128   ;;  %s231_s21 = smov 8  }
   0x5   :  { %23 = dma.hbm_to_vmem [thread:$0]  %s16_s14, 256, %s18_s16, [#allocation3], %s230_s20, %s230_s20, %s231_s21  }
   0x6   :  { %s232_s22 = smov [#allocation5]  }
   0x7   :  { %s31_s23 = sshll.u32 %s232_s22, 4  ;;  %s32_s23 = int_to_ptr.vmem [resolvable:$true] %s31_s23 }
   0x8   :  { %34 = dma.hbm_to_vmem [thread:$0]  %s30_s19, 16, %s32_s23, [#allocation6]  }
   0x9   :  { %223 = dma.done.wait [#allocation3], 256  }
   0xa   :  { %224 = vsyncadd [#allocation3], 4294967040 }
   0xb   :  { %225 = dma.done.wait [#allocation6], 16  }
   0xc   :  { %226 = vsyncadd [#allocation6], 4294967280  ;;  %v45_v0 = vld [vmem:[#allocation2] sm:$0xff]  ;;  %v46_v1 = vld [vmem:[#allocation2 + $0x8] sm:$0xff]  ;;  %v233_v2 = vmov 128.0   ;;  %s234_s24 = smov [#allocation7]  }
   0xd   :  { %47 = vadd.xlane.f32.xlu0 %v45_v0  ;;  %145 = vrcp.f32 %v233_v2  ;;  %v143_v35 = vld [vmem:[#allocation5] ss:$0 sm:$0xff]  ;;  %v144_v41 = vld [vmem:[%s271_s2] ss:$0 sm:$0xff]  ;;  %s114_s25 = sshll.u32 %s234_s24, 4  ;;  %s116_s28 = sshll.u32 %s272_s3, 4  ;;  %s115_s25 = int_to_ptr.vmem [resolvable:$true] %s114_s25  ;;  %s117_s28 = int_to_ptr.hbm [resolvable:$true] %s116_s28 }
   0xe   :  { %s235_s29 = smov 64   ;;  %s236_s30 = smov 4  }
  0x13   :  { %v146_v3 = vpop.eup %145 }
  0x14   :  { %v52_v4 = vmul.f32 128.0, %v146_v3  ;;  %vm56_vm0 = vweird.f32 %v146_v3 }
  0x15   :  { %49 = vadd.xlane.f32.xlu0 %v46_v1 }
  0x16   :  { %v53_v5 = vsub.f32 1.0, %v52_v4 }
  0x18   :  { %v54_v6 = vmul.f32 %v146_v3, %v53_v5 }
  0x1a   :  { %v55_v7 = vadd.f32 %v146_v3, %v54_v6 }
  0x1c   :  { %v57_v8 = vsel %vm56_vm0, %v146_v3, %v55_v7 }
  0x80   :  { %v48_v9 = vpop.xlane.xlu0 %47 }
  0x81   :  { %v58_v10 = vmul.f32 %v57_v8, %v48_v9 }
  0x83   :  { %v60_v11 = vsub.f32 %v45_v0, %v58_v10 }
  0x85   :  { %v62_v12 = vmul.f32 %v60_v11, %v60_v11 }
  0x87   :  { %64 = vadd.xlane.f32.xlu1 %v62_v12 }
  0x88   :  { %v50_v13 = vpop.xlane.xlu0 %49 }
  0x89   :  { %v59_v14 = vmul.f32 %v57_v8, %v50_v13 }
  0x8b   :  { %v61_v15 = vsub.f32 %v46_v1, %v59_v14 }
  0x8d   :  { %v63_v16 = vmul.f32 %v61_v15, %v61_v15 }
  0x8f   :  { %66 = vadd.xlane.f32.xlu1 %v63_v16 }
  0xfa   :  { %v65_v17 = vpop.xlane.xlu1 %64 }
  0xfb   :  { %v68_v18 = vmul.f32 %v65_v17, %v57_v8 }
  0xfd   :  { %v70_v19 = vadd.f32 1e-12, %v68_v18 }
  0xff   :  { %147 = vrsqrt.f32 %v70_v19  ;;  %vm78_vm2 = vweird.f32 %v70_v19 }
 0x102   :  { %v67_v20 = vpop.xlane.xlu1 %66 }
 0x103   :  { %v69_v21 = vmul.f32 %v67_v20, %v57_v8 }
 0x105   :  { %v148_v22 = vpop.eup %147  ;;  %v71_v23 = vadd.f32 1e-12, %v69_v21 }
 0x106   :  { %v73_v24 = vmul.f32 %v148_v22, %v70_v19  ;;  %vm79_vm1 = vweird.f32 %v148_v22 }
 0x107   :  { %149 = vrsqrt.f32 %v71_v23  ;;  %vm80_vm3 = vmor %vm78_vm2, %vm79_vm1  ;;  %vm88_vm5 = vweird.f32 %v71_v23 }
 0x108   :  { %v74_v25 = vmul.f32 %v148_v22, %v73_v24 }
 0x10a   :  { %v75_v26 = vmul.f32 0.5, %v74_v25 }
 0x10c   :  { %v76_v27 = vsub.f32 1.5, %v75_v26 }
 0x10d   :  { %v150_v28 = vpop.eup %149 }
 0x10e   :  { %v77_v29 = vmul.f32 %v148_v22, %v76_v27  ;;  %v83_v30 = vmul.f32 %v150_v28, %v71_v23  ;;  %vm89_vm4 = vweird.f32 %v150_v28 }
 0x10f   :  { %vm90_vm6 = vmor %vm88_vm5, %vm89_vm4 }
 0x110   :  { %v84_v31 = vmul.f32 %v150_v28, %v83_v30  ;;  %v81_v32 = vsel %vm80_vm3, %v148_v22, %v77_v29 }
 0x111   :  { %v92_v36 = vmul.f32 %v81_v32, %v60_v11 }
 0x112   :  { %v85_v33 = vmul.f32 0.5, %v84_v31 }
 0x113   :  { %v98_v39 = vmul.f32 %v143_v35, %v92_v36 }
 0x114   :  { %v86_v34 = vsub.f32 1.5, %v85_v33 }
 0x115   :  { %v104_v43 = vadd.f32 %v144_v41, %v98_v39 }
 0x116   :  { %v87_v37 = vmul.f32 %v150_v28, %v86_v34 }
 0x118   :  { %v91_v38 = vsel %vm90_vm6, %v150_v28, %v87_v37 }
 0x119   :  { %v93_v40 = vmul.f32 %v91_v38, %v61_v15 }
 0x11b   :  { %v99_v42 = vmul.f32 %v143_v35, %v93_v40 }
 0x11d   :  { %v105_v44 = vadd.f32 %v144_v41, %v99_v42 }
 0x11f   :  { %v133_v45 = vpack.c.bf16 %v105_v44, %v104_v43 }
 0x121   :  { %134 = vst [vmem:[#allocation7] sm:$0xff] %v133_v45  }
 0x122   :  { %122 = dma.vmem_to_hbm [thread:$0]  %s115_s25, 128, %s117_s28, [#allocation4], %s235_s29, %s235_s29, %s236_s30  }
 0x123   :  { %227 = dma.done.wait [#allocation4], 128  }
 0x124   :  { %228 = vsyncadd [#allocation4], 4294967168 }
 0x125   :  { %127 = vsyncpa [#allocation3], 1 }
 0x126   :  { %128 = vsyncpa [#allocation6], 1 }
 0x127   :  { %129 = vsyncpa [#allocation4], 1 }

</bundles_post_ra>
